<compile_context>
chip_gen: v7x
topology: tpu7x:2x2x1
jax: 0.10.0
libtpu: 0.0.40
codegen_flags: <defaults>
</compile_context>

<pallas_src>
import functools

import jax
import jax.numpy as jnp
from jax.experimental import pallas as pl
from jax.experimental.pallas import tpu as pltpu


# ---------------------------------------------------------------------------
# Kernel
# ---------------------------------------------------------------------------

def _apply_activation(x, activation):
    if activation is None:
        return x
    if activation == "relu":
        return jnp.maximum(x, 0.0)
    if activation == "tanh":
        return jnp.tanh(x)
    if activation == "sigmoid":
        return jax.nn.sigmoid(x)
    raise ValueError(f"unknown activation: {activation}")


def _linear_kernel(*refs, n_k, use_bias, activation, use_acc_scratch):
    """Tiled matmul + (optional) bias + (optional) activation.

    Grid = (M/tm, N/tn, K/tk); K is the innermost (reduction, "arbitrary") axis.
    refs = (x, w, [bias], out, [acc_scratch])  -- statically determined layout.
    """
    idx = 0
    x_ref = refs[idx]; idx += 1
    w_ref = refs[idx]; idx += 1
    b_ref = None
    if use_bias:
        b_ref = refs[idx]; idx += 1
    o_ref = refs[idx]; idx += 1
    acc_ref = refs[idx] if use_acc_scratch else o_ref

    def epilogue(acc_f32):
        if use_bias:
            acc_f32 = acc_f32 + b_ref[...].astype(jnp.float32)  # (1, tn) broadcasts
        acc_f32 = _apply_activation(acc_f32, activation)
        return acc_f32.astype(o_ref.dtype)

    if n_k == 1:
        # Single K step: compute -> epilogue -> one store. No accumulator pattern.
        acc = jnp.dot(x_ref[...], w_ref[...], preferred_element_type=jnp.float32)
        o_ref[...] = epilogue(acc)
    else:
        k = pl.program_id(2)

        @pl.when(k == 0)
        def _():
            acc_ref[...] = jnp.zeros_like(acc_ref)

        acc_ref[...] += jnp.dot(
            x_ref[...], w_ref[...], preferred_element_type=jnp.float32
        )

        @pl.when(k == n_k - 1)
        def _():
            o_ref[...] = epilogue(acc_ref[...])


# ---------------------------------------------------------------------------
# Wrapper
# ---------------------------------------------------------------------------

def _pick_tile(dim, cap, align):
    """Largest MXU-aligned tile <= cap that divides dim; else the full axis."""
    if dim <= cap:
        return dim                      # full-extent block is always legal
    t = (cap // align) * align
    while t >= align:
        if dim % t == 0:
            return t
        t -= align
    return dim                          # no aligned divisor: one block per axis


@functools.partial(jax.jit, static_argnames=("use_bias", "activation"))
def linear_forward(x, weight, bias=None, *, use_bias=True, activation=None):
    M, K = x.shape
    Kw, N = weight.shape
    assert K == Kw, "input_size mismatch"
    if use_bias:
        assert bias is not None and bias.shape == (1, N)

    out_dtype = x.dtype
    in_bytes = x.dtype.itemsize
    out_bytes = jnp.dtype(out_dtype).itemsize

    # Large, MXU-aligned tiles; lane-dense output (tn cap > tm cap).
    tm = _pick_tile(M, 256, 8)
    tn = _pick_tile(N, 512, 128)
    tk = _pick_tile(K, 512, 128)
    n_m, n_n, n_k = M // tm, N // tn, K // tk

    # f32 outputs accumulate directly in the resident output block.
    use_acc_scratch = (n_k > 1) and (out_dtype != jnp.float32)

    # VMEM budget: double-buffered inputs + output buffers (+ bias, + acc scratch).
    vmem_bytes = 2 * (tm * tk + tk * tn) * in_bytes + 2 * tm * tn * out_bytes
    if use_bias:
        vmem_bytes += 2 * tn * bias.dtype.itemsize
    if use_acc_scratch:
        vmem_bytes += tm * tn * 4
    vmem_limit = min(max(32 * 1024 * 1024, vmem_bytes + (4 << 20)), 48 * 1024 * 1024)

    in_specs = [
        pl.BlockSpec((tm, tk), lambda i, j, k: (i, k)),   # x tile
        pl.BlockSpec((tk, tn), lambda i, j, k: (k, j)),   # weight tile
    ]
    args = (x, weight)
    if use_bias:
        in_specs.append(pl.BlockSpec((1, tn), lambda i, j, k: (0, j)))
        args = args + (bias,)

    scratch_shapes = (
        [pltpu.VMEM((tm, tn), jnp.float32)] if use_acc_scratch else []
    )

    kernel = functools.partial(
        _linear_kernel,
        n_k=n_k,
        use_bias=use_bias,
        activation=activation,
        use_acc_scratch=use_acc_scratch,
    )

    return pl.pallas_call(
        kernel,
        out_shape=jax.ShapeDtypeStruct((M, N), out_dtype),
        grid_spec=pltpu.PrefetchScalarGridSpec(
            num_scalar_prefetch=0,
            grid=(n_m, n_n, n_k),
            in_specs=in_specs,
            out_specs=pl.BlockSpec((tm, tn), lambda i, j, k: (i, j)),
            scratch_shapes=scratch_shapes,
        ),
        compiler_params=pltpu.CompilerParams(
            dimension_semantics=("parallel", "parallel", "arbitrary"),
            vmem_limit_bytes=vmem_limit,
        ),
    )(*args)


# ---------------------------------------------------------------------------
# MLP (mirrors the PyTorch module)
# ---------------------------------------------------------------------------

def layer_sizes(input_size, output_size, num_layers):
    sizes = [input_size] * num_layers + [output_size]
    return list(zip(sizes[:-1], sizes[1:]))


def init_mlp_params(key, input_size, output_size, num_layers=1, dtype=jnp.float32):
    params = []
    for in_s, out_s in layer_sizes(input_size, output_size, num_layers):
        key, kw = jax.random.split(key)
        k = 1.0 / in_s ** 0.5
        w = jax.random.uniform(kw, (in_s, out_s), dtype=dtype, minval=-k, maxval=k)
        b = jnp.zeros((1, out_s), dtype=dtype)
        params.append((w, b))
    return params


def mlp_forward(x, params, *, use_bias=True, activation=None):
    n = len(params)
    for i, (w, b) in enumerate(params):
        act = activation if i < n - 1 else None          # no activation after last layer
        x = linear_forward(
            x, w, b if use_bias else None, use_bias=use_bias, activation=act
        )
    return x


# ---------------------------------------------------------------------------
# Demo / self-check
# ---------------------------------------------------------------------------

if __name__ == "__main__":
    input_size, output_size, num_layers = 32, 128, 2
    batch = 8
    activation = "relu"

    key = jax.random.PRNGKey(0)
    kx, kp = jax.random.split(key)
    params = init_mlp_params(kp, input_size, output_size, num_layers)
    x = jax.random.normal(kx, (batch, input_size), dtype=jnp.float32)

    out = mlp_forward(x, params, use_bias=True, activation=activation)
    out = jax.block_until_ready(out)

    # Plain-JAX reference of MLP.forward (eval mode, dropout=0.0)
    ref = x
    for i, (w, b) in enumerate(params):
        ref = ref @ w + b
        if i < num_layers - 1:
            ref = jnp.maximum(ref, 0.0)

    assert out.shape == (batch, output_size)
    assert jnp.allclose(out, ref, atol=1e-5, rtol=1e-5), "mismatch vs reference"

    print("KERNEL_OK")
</pallas_src>

<mosaic_0001>
module attributes {stable_mosaic.version = 11 : i64} {
  func.func @_linear_kernel(%arg0: i32, %arg1: i32, %arg2: i32, %arg3: memref<8x32xf32, #tpu.memory_space<vmem>>, %arg4: memref<32x32xf32, #tpu.memory_space<vmem>>, %arg5: memref<1x32xf32, #tpu.memory_space<vmem>>, %arg6: memref<8x32xf32, #tpu.memory_space<vmem>>) attributes {dimension_semantics = [#tpu.dimension_semantics<parallel>, #tpu.dimension_semantics<parallel>, #tpu.dimension_semantics<arbitrary>], iteration_bounds = array<i64: 1, 1, 1>, scalar_prefetch = 0 : i64, scratch_operands = 0 : i64, tpu.core_type = #tpu.core_type<tc>, window_params = [{transform_indices = @transform_0, window_bounds = array<i64: 8, 32>}, {transform_indices = @transform_1, window_bounds = array<i64: 32, 32>}, {transform_indices = @transform_2, window_bounds = array<i64: 1, 32>}, {transform_indices = @transform_3, window_bounds = array<i64: 8, 32>}]} {
    %c0 = arith.constant 0 : index
    %c0_0 = arith.constant 0 : index
    %0 = vector.load %arg3[%c0, %c0_0] : memref<8x32xf32, #tpu.memory_space<vmem>>, vector<8x32xf32>
    %c0_1 = arith.constant 0 : index
    %c0_2 = arith.constant 0 : index
    %1 = vector.load %arg4[%c0_1, %c0_2] : memref<32x32xf32, #tpu.memory_space<vmem>>, vector<32x32xf32>
    %cst = arith.constant dense<0.000000e+00> : vector<8x32xf32>
    %2 = tpu.matmul %0, %1, %cst {dimension_numbers = #tpu.dot_dimension_numbers<[1], [0], [0], [1], [0, 0, 1, 1], [], []>} : vector<8x32xf32>, vector<32x32xf32>, vector<8x32xf32> -> vector<8x32xf32>
    %c0_3 = arith.constant 0 : index
    %c0_4 = arith.constant 0 : index
    %3 = vector.load %arg5[%c0_3, %c0_4] : memref<1x32xf32, #tpu.memory_space<vmem>>, vector<1x32xf32>
    %4 = vector.broadcast %3 : vector<1x32xf32> to vector<8x32xf32>
    %5 = arith.addf %2, %4 : vector<8x32xf32>
    %cst_5 = arith.constant 0.000000e+00 : f32
    %6 = vector.broadcast %cst_5 : f32 to vector<8x32xf32>
    %7 = arith.maximumf %5, %6 : vector<8x32xf32>
    %c0_6 = arith.constant 0 : index
    %c0_7 = arith.constant 0 : index
    %8 = vector.load %arg6[%c0_6, %c0_7] : memref<8x32xf32, #tpu.memory_space<vmem>>, vector<8x32xf32>
    tpu.vector_store %arg6[%c0_6, %c0_7], %7 {strides = array<i32>} : memref<8x32xf32, #tpu.memory_space<vmem>>, vector<8x32xf32>,
    return
  }
  func.func @transform_0(%arg0: i32, %arg1: i32, %arg2: i32) -> (i32, i32) {
    %c0_i32 = arith.constant 0 : i32
    return %arg0, %arg2 : i32, i32
  }
  func.func @transform_1(%arg0: i32, %arg1: i32, %arg2: i32) -> (i32, i32) {
    %c0_i32 = arith.constant 0 : i32
    return %arg2, %arg1 : i32, i32
  }
  func.func @transform_2(%arg0: i32, %arg1: i32, %arg2: i32) -> (i32, i32) {
    %c0_i32 = arith.constant 0 : i32
    %c0_i32_0 = arith.constant 0 : i32
    return %c0_i32, %arg1 : i32, i32
  }
  func.func @transform_3(%arg0: i32, %arg1: i32, %arg2: i32) -> (i32, i32) {
    %c0_i32 = arith.constant 0 : i32
    return %arg0, %arg1 : i32, i32
  }
}

</mosaic_0001>

<bundles_post_ra>
// kernel: linear_forward.1
= control target key start
LH: loop header
LB: loop body
LE: loop exit
PB: predicated region body
PF: predicated region fallthrough
CT: control target
= control target key end

     0   :  { %8 = vsyncpa [#allocation3], 0  ;;  %s323_s0 = inlined_call_operand.hbm [shape: f32[8,32], index: 0, kind: input, shape index: {}]   ;;  %s324_s1 = inlined_call_operand.hbm [shape: f32[32,32], index: 1, kind: input, shape index: {}]   ;;  %s325_s2 = inlined_call_operand.vmem [shape: f32[1,32], index: 2, kind: input, shape index: {}]   ;;  %s326_s3 = inlined_call_operand.hbm [shape: f32[8,32], index: 3, kind: output, shape index: {}]  }
   0x1   :  { %9 = vsyncpa [#allocation6], 0 }
   0x2   :  { %10 = vsyncpa [#allocation4], 0  ;;  %s249_s12 = smov [#allocation2]   ;;  %s250_s14 = smov [#allocation5]  }
   0x3   :  { %s17_s13 = sshll.u32 %s249_s12, 4  ;;  %s26_s15 = sshll.u32 %s250_s14, 4  ;;  %s18_s13 = int_to_ptr.vmem [resolvable:$true] %s17_s13  ;;  %s277_s15 = int_to_ptr.vmem [resolvable:$true] %s26_s15 }
   0x4   :  { %s177_s18 = scalar_lea.hbm %s323_s0, 128 }
   0x5   :  { %p178_p0 = scmp.ne.s32.totalorder %s323_s0, %s177_s18  ;;  %p181_p1 = scmp.lt.u32.totalorder %s177_s18, %s323_s0 }
   0x7   :  { %p183_p2 = pnand %p181_p1, %p178_p0 }
   0x9   :  { %186 = shalt.err (!%p183_p2)
}
   0xa   :  { %s187_s23 = scalar_lea.vmem %s18_s13, 128  ;;  %p192_p4 = scmp.lt.s32.totalorder %s18_s13, %s18_s13 }
   0xb   :  { %p188_p3 = scmp.ne.s32.totalorder %s18_s13, %s187_s23  ;;  %p193_p5 = scmp.lt.s32.totalorder %s187_s23, %s187_s23 }
   0xd   :  { %p194_p6 = por %p193_p5, %p192_p4 }
   0xf   :  { %p195_p7 = pnand %p194_p6, %p188_p3 }
  0x11   :  { %198 = shalt.err (!%p195_p7)
}
  0x12   :  { %20 = dma.hbm_to_vmem [thread:$0]  %s323_s0, 128, %s18_s13, [#allocation3]  }
  0x13   :  { %s199_s28 = scalar_lea.hbm %s324_s1, 512 }
  0x14   :  { %p200_p8 = scmp.ne.s32.totalorder %s324_s1, %s199_s28  ;;  %p203_p9 = scmp.lt.u32.totalorder %s199_s28, %s324_s1 }
  0x16   :  { %p205_p10 = pnand %p203_p9, %p200_p8 }
  0x18   :  { %208 = shalt.err (!%p205_p10)
}
  0x19   :  { %s209_s6 = scalar_lea.vmem %s277_s15, 512  ;;  %p214_p12 = scmp.lt.s32.totalorder %s277_s15, %s277_s15 }
  0x1a   :  { %p210_p11 = scmp.ne.s32.totalorder %s277_s15, %s209_s6  ;;  %p215_p13 = scmp.lt.s32.totalorder %s209_s6, %s209_s6 }
  0x1c   :  { %p216_p0 = por %p215_p13, %p214_p12 }
  0x1e   :  { %p217_p1 = pnand %p216_p0, %p210_p11 }
  0x20   :  { %220 = shalt.err (!%p217_p1)
}
  0x21   :  { %s251_s0 = smov 128   ;;  %s252_s7 = smov 8  }
  0x22   :  { %32 = dma.hbm_to_vmem [thread:$0]  %s324_s1, 512, %s277_s15, [#allocation6], %s251_s0, %s251_s0, %s252_s7  }
  0x23   :  { %243 = dma.done.wait [#allocation3], 128  }
  0x24   :  { %244 = vsyncadd [#allocation3], 4294967168 }
  0x25   :  { %245 = dma.done.wait [#allocation6], 512  }
  0x26   :  { %246 = vsyncadd [#allocation6], 4294966784  ;;  %v253_v0 = vmov 0.0|0.0   ;;  %vm254_vm0 = vmmov 0   ;;  %v255_v1 = vmov 0.0   ;;  %v42_v2 = vld [vmem:[#allocation5] sm:$0xff] }
  0x27   :  { %163 = vmatprep.subr.bf16.mxu0 %v253_v0  ;;  %160 = vmatprep.mubr.msk.f32.mxu0 %vm254_vm0, %v255_v1  ;;  %v43_v3 = vld [vmem:[#allocation5 + $0x8] sm:$0xff]  ;;  %v44_v4 = vld [vmem:[#allocation5 + $0x10] sm:$0xff]  ;;  %v45_v6 = vld [vmem:[#allocation5 + $0x18] sm:$0xff]  ;;  %vm53_vm1 = vcmask 261120   ;;  %s256_s11 = smov [#allocation7]  }
  0x28   :  { %v164_v5 = vpack.c.bf16 %v43_v3, %v42_v2  ;;  %v167_v7 = vpack.c.bf16 %v45_v6, %v44_v4  ;;  %v41_v8 = vld [vmem:[#allocation2] sm:$0xff]  ;;  %s135_s12 = sshll.u32 %s256_s11, 4  ;;  %s136_s12 = int_to_ptr.vmem [resolvable:$true] %s135_s12 }
  0x29   :  { %v145_v9 = vld [vmem:[%s325_s2] ss:$0 sm:$0xff]  ;;  %s221_s13 = scalar_lea.vmem %s136_s12, 128  ;;  %p226_p3 = scmp.lt.s32.totalorder %s136_s12, %s136_s12 }
  0x2a   :  { %165 = vmatpush3.bf16.msra.mxu0 %v164_v5  ;;  %p222_p2 = scmp.ne.s32.totalorder %s136_s12, %s221_s13  ;;  %p227_p4 = scmp.lt.s32.totalorder %s221_s13, %s221_s13 }
  0x2b   :  { %166 = vmatprep.subr.bf16.mxu0 %v253_v0 }
  0x2c   :  { %p228_p5 = por %p227_p4, %p226_p3 }
  0x2e   :  { %168 = vmatpush3.bf16.msra.mxu0 %v167_v7  ;;  %p229_p6 = pnand %p228_p5, %p222_p2 }
  0x31   :  { %161 = vmatmul.mubr.msk.f32.vlgmr.msra.gmra.mrb[0].mxu0 %vm53_vm1, %v41_v8 }
 0x104   :  { %v123_v10 = vpop.f32.mrb[0].mxu0 }
 0x105   :  { %v124_v11 = vadd.f32 %v145_v9, %v123_v10  ;;  %v162_v12 = vpop.f32.mrb[1].mxu0 }
 0x107   :  { %v127_v13 = vmax.f32 %v124_v11, 0.0 }
 0x109   :  { %128 = vst.msk [vmem:[#allocation7] sm:$0xff] %vm53_vm1, %v127_v13 }
 0x10a   :  { %232 = shalt.err (!%p229_p6)
}
 0x10b   :  { %s233_s16 = scalar_lea.hbm %s326_s3, 128 }
 0x10c   :  { %p234_p7 = scmp.ne.s32.totalorder %s326_s3, %s233_s16  ;;  %p237_p8 = scmp.lt.u32.totalorder %s233_s16, %s326_s3 }
 0x10e   :  { %p239_p9 = pnand %p237_p8, %p234_p7 }
 0x110   :  { %242 = shalt.err (!%p239_p9)
}
 0x111   :  { %138 = dma.vmem_to_hbm [thread:$0]  %s136_s12, 128, %s326_s3, [#allocation4]  }
 0x112   :  { %247 = dma.done.wait [#allocation4], 128  }
 0x113   :  { %248 = vsyncadd [#allocation4], 4294967168 }
 0x114   :  { %142 = vsyncpa [#allocation3], 1 }
 0x115   :  { %143 = vsyncpa [#allocation6], 1 }
 0x116   :  { %144 = vsyncpa [#allocation4], 1 }

</bundles_post_ra>
